<compile_context>
chip_gen: v5e
topology: v5e:2x2
jax: 0.10.0
libtpu: 0.0.40
codegen_flags: <defaults>
</compile_context>

<pallas_src>
import functools

import jax
import jax.numpy as jnp
from jax.experimental import pallas as pl
from jax.experimental.pallas import tpu as pltpu

# Lane chunk processed at once inside the kernel.  Keeps the largest live
# intermediate (the (128, SUB_B) f32 fc1 activation) at 32 vregs.
SUB_B = 256


def mlp_kernel(x_ref,
               w1_ref, b1_ref,
               w2_ref, b2_ref,
               w3_ref, b3_ref,
               w4_ref, b4_ref,
               w5_ref, b5_ref,
               o_ref, *, n_sub):
    """Fused 5-layer MLP on one feature-major (F, tile_b) batch tile.

    x_ref : f32  (F, tile_b)   — cast to bf16 in-kernel right before fc1.
    w1..w4: bf16 (out, in)     — MXU operands (PyTorch nn.Linear orientation).
    b1..b4: f32  (out, 1)      — broadcast along the lane (batch) axis.
    w5    : f32  (16, 1),  b5: f32 (1, 1)  — fc5 runs on the VPU/XLU.
    o_ref : f32  (1, tile_b)   — lane-dense, unmasked store.
    """

    def compute(off):
        # `off` is a Python int -> static ref slices (zero-cost views).
        x = x_ref[:, off:off + SUB_B].astype(jnp.bfloat16)       # (F, SUB_B)

        # fc1..fc4: bf16 MXU matmuls with f32 accumulation; bias + ReLU in f32
        # on the VPU (v5e has no bf16 VPU).
        h = jnp.dot(w1_ref[...], x,
                    preferred_element_type=jnp.float32) + b1_ref[...]
        h = jnp.maximum(h, 0.0)                                   # (128, SUB_B)

        h = jnp.dot(w2_ref[...], h.astype(jnp.bfloat16),
                    preferred_element_type=jnp.float32) + b2_ref[...]
        h = jnp.maximum(h, 0.0)                                   # (64, SUB_B)

        h = jnp.dot(w3_ref[...], h.astype(jnp.bfloat16),
                    preferred_element_type=jnp.float32) + b3_ref[...]
        h = jnp.maximum(h, 0.0)                                   # (32, SUB_B)

        h = jnp.dot(w4_ref[...], h.astype(jnp.bfloat16),
                    preferred_element_type=jnp.float32) + b4_ref[...]
        h = jnp.maximum(h, 0.0)                                   # (16, SUB_B)

        # fc5 (16 -> 1): VPU multiply + cross-sublane reduce (XLU) instead of
        # an N=1 MXU pass; result stays lane-dense.  Kept in f32.
        out = jnp.sum(h * w5_ref[...], axis=0, keepdims=True) + b5_ref[...]
        o_ref[:, off:off + SUB_B] = out.astype(o_ref.dtype)       # (1, SUB_B)

    # Sub-block larger tiles in independent 256-lane chunks (each chunk's
    # intermediates die at its store).  If a bundle dump ever shows spills at
    # n_sub > 1, switch this to lax.fori_loop with pl.ds + pl.multiple_of.
    for s in range(n_sub):
        compute(s * SUB_B)


def prepare_params(params):
    """One-time weight/bias layout + dtype prep (hoisted out of mlp_forward).

    Input: PyTorch-convention params [(W (out, in) f32, b (out,) f32), ...].
    Output: w1..w4 bf16 (out, in); b1..b4 f32 (out, 1); w5 f32 (16, 1);
    b5 f32 (1, 1).
    """
    (w1, b1), (w2, b2), (w3, b3), (w4, b4), (w5, b5) = params
    prepped = []
    for w, b in ((w1, b1), (w2, b2), (w3, b3), (w4, b4)):
        prepped.append((w.astype(jnp.bfloat16),
                        b.reshape(-1, 1).astype(jnp.float32)))
    prepped.append((w5.reshape(-1, 1).astype(jnp.float32),   # (16, 1)
                    b5.reshape(1, 1).astype(jnp.float32)))   # (1, 1)
    return prepped


def mlp_forward(x, prepared_params, *, tile_b=256):
    """x: (B, F) f32.  prepared_params: output of prepare_params().

    Computes y = relu(...relu(x @ W1^T + b1)...) @ W5^T + b5, matching the
    PyTorch MLP forward.

    tile_b: batch columns per grid step (multiple of SUB_B).  256 keeps
    grid_b even and >= 2 at the demo batch (both v7x TensorCores busy); on
    single-TC chips (v5e/v6e) raise to 512-1024 for large B — the kernel
    sub-blocks internally and VMEM stays ~100 KiB either way.
    """
    assert tile_b % SUB_B == 0, "tile_b must be a multiple of SUB_B (256)"
    B, F = x.shape
    grid_b = pl.cdiv(B, tile_b)
    B_pad = grid_b * tile_b

    # Feature-major (lane-dense) input.  No wrapper-side dtype cast: x is cast
    # to bf16 inside the kernel, so it is read from HBM exactly once (f32).
    xt = x.T                                    # (F, B)
    if B_pad != B:
        # Padded batch columns compute garbage but rows are independent and
        # sliced off below — never add cross-batch reductions to this kernel.
        xt = jnp.pad(xt, ((0, 0), (0, B_pad - B)))

    (w1, b1), (w2, b2), (w3, b3), (w4, b4), (w5, b5) = prepared_params

    def const_spec(arr):
        # Constant index_map: same block every grid step, so Pallas keeps the
        # ~47 KiB of weights/biases VMEM-resident and never re-DMAs them.
        return pl.BlockSpec(arr.shape, lambda i: (0, 0))

    in_specs = [pl.BlockSpec((F, tile_b), lambda i: (0, i))]
    flat_args = [xt]
    for w, b in ((w1, b1), (w2, b2), (w3, b3), (w4, b4), (w5, b5)):
        in_specs += [const_spec(w), const_spec(b)]
        flat_args += [w, b]

    out = pl.pallas_call(
        functools.partial(mlp_kernel, n_sub=tile_b // SUB_B),
        out_shape=jax.ShapeDtypeStruct((1, B_pad), jnp.float32),
        grid_spec=pltpu.PrefetchScalarGridSpec(
            num_scalar_prefetch=0,
            grid=(grid_b,),
            in_specs=in_specs,
            # Lane-dense (1, tile_b) output block -> unmasked vector stores.
            out_specs=pl.BlockSpec((1, tile_b), lambda i: (0, i)),
        ),
        compiler_params=pltpu.CompilerParams(
            dimension_semantics=("parallel",),   # shards batch across TCs (v7x)
        ),
    )(*flat_args)

    return out.reshape(-1)[:B].reshape(B, 1)


def init_params(key, input_size):
    """Deterministic synthetic init matching nn.Linear shapes: W (out, in), b (out,)."""
    dims = [input_size, 128, 64, 32, 16, 1]
    params = []
    for i in range(5):
        key, kw, kb = jax.random.split(key, 3)
        bound = 1.0 / jnp.sqrt(jnp.float32(dims[i]))
        w = jax.random.uniform(kw, (dims[i + 1], dims[i]), jnp.float32,
                               minval=-1.0, maxval=1.0) * bound
        b = jax.random.uniform(kb, (dims[i + 1],), jnp.float32,
                               minval=-1.0, maxval=1.0) * bound
        params.append((w, b))
    return params


def mlp_reference(x, params):
    """Reference with the same numerics as the kernel: bf16 MXU inputs with
    f32 accumulation for fc1..fc4, f32 bias/ReLU, pure-f32 fc5."""
    h = x
    for w, b in params[:4]:
        h = jnp.dot(h.astype(jnp.bfloat16), w.T.astype(jnp.bfloat16),
                    preferred_element_type=jnp.float32) + b
        h = jnp.maximum(h, 0.0)
    w5, b5 = params[4]
    return jnp.dot(h, w5.T) + b5            # (B, 1) f32


if __name__ == "__main__":
    key = jax.random.PRNGKey(0)
    input_size = 8      # California housing feature count
    batch = 512

    key, kx = jax.random.split(key)
    x = jax.random.normal(kx, (batch, input_size), jnp.float32)
    params = init_params(key, input_size)
    prepped = prepare_params(params)        # one-time weight layout/dtype prep

    ref = mlp_reference(x, params)

    # Default config: tile_b=256 -> grid_b=2 (even, uses both TCs on v7x).
    out = jax.block_until_ready(mlp_forward(x, prepped, tile_b=256))
    assert out.shape == (batch, 1)
    assert jnp.allclose(out, ref, atol=1e-3, rtol=1e-3), "mismatch (tile_b=256)"

    # Larger-tile config (single grid step, 2 in-kernel sub-blocks) — the
    # "fewer, bigger steps" setting for single-TC v5e/v6e; exercises the
    # sub-block path.
    out2 = jax.block_until_ready(mlp_forward(x, prepped, tile_b=512))
    assert out2.shape == (batch, 1)
    assert jnp.allclose(out2, ref, atol=1e-3, rtol=1e-3), "mismatch (tile_b=512)"

    print("KERNEL_OK")
</pallas_src>

<mosaic_0001>
module attributes {stable_mosaic.version = 11 : i64} {
  func.func @mlp_kernel(%arg0: i32, %arg1: memref<8x256xf32, #tpu.memory_space<vmem>>, %arg2: memref<128x8xbf16, #tpu.memory_space<vmem>>, %arg3: memref<128x1xf32, #tpu.memory_space<vmem>>, %arg4: memref<64x128xbf16, #tpu.memory_space<vmem>>, %arg5: memref<64x1xf32, #tpu.memory_space<vmem>>, %arg6: memref<32x64xbf16, #tpu.memory_space<vmem>>, %arg7: memref<32x1xf32, #tpu.memory_space<vmem>>, %arg8: memref<16x32xbf16, #tpu.memory_space<vmem>>, %arg9: memref<16x1xf32, #tpu.memory_space<vmem>>, %arg10: memref<16x1xf32, #tpu.memory_space<vmem>>, %arg11: memref<1x1xf32, #tpu.memory_space<vmem>>, %arg12: memref<1x256xf32, #tpu.memory_space<vmem>>) attributes {dimension_semantics = [#tpu.dimension_semantics<parallel>], iteration_bounds = array<i64: 2>, scalar_prefetch = 0 : i64, scratch_operands = 0 : i64, tpu.core_type = #tpu.core_type<tc>, window_params = [{transform_indices = @transform_0, window_bounds = array<i64: 8, 256>}, {pipeline_mode = #tpu.pipeline_mode<synchronous>, transform_indices = @transform_1, window_bounds = array<i64: 128, 8>}, {pipeline_mode = #tpu.pipeline_mode<synchronous>, transform_indices = @transform_2, window_bounds = array<i64: 128, 1>}, {pipeline_mode = #tpu.pipeline_mode<synchronous>, transform_indices = @transform_3, window_bounds = array<i64: 64, 128>}, {pipeline_mode = #tpu.pipeline_mode<synchronous>, transform_indices = @transform_4, window_bounds = array<i64: 64, 1>}, {pipeline_mode = #tpu.pipeline_mode<synchronous>, transform_indices = @transform_5, window_bounds = array<i64: 32, 64>}, {pipeline_mode = #tpu.pipeline_mode<synchronous>, transform_indices = @transform_6, window_bounds = array<i64: 32, 1>}, {pipeline_mode = #tpu.pipeline_mode<synchronous>, transform_indices = @transform_7, window_bounds = array<i64: 16, 32>}, {pipeline_mode = #tpu.pipeline_mode<synchronous>, transform_indices = @transform_8, window_bounds = array<i64: 16, 1>}, {pipeline_mode = #tpu.pipeline_mode<synchronous>, transform_indices = @transform_9, window_bounds = array<i64: 16, 1>}, {pipeline_mode = #tpu.pipeline_mode<synchronous>, transform_indices = @transform_10, window_bounds = array<i64: 1, 1>}, {transform_indices = @transform_11, window_bounds = array<i64: 1, 256>}]} {
    %c0 = arith.constant 0 : index
    %c0_0 = arith.constant 0 : index
    %0 = vector.load %arg1[%c0, %c0_0] : memref<8x256xf32, #tpu.memory_space<vmem>>, vector<8x256xf32>
    %1 = arith.truncf %0 : vector<8x256xf32> to vector<8x256xbf16>
    %c0_1 = arith.constant 0 : index
    %c0_2 = arith.constant 0 : index
    %2 = vector.load %arg2[%c0_1, %c0_2] : memref<128x8xbf16, #tpu.memory_space<vmem>>, vector<128x8xbf16>
    %cst = arith.constant dense<0.000000e+00> : vector<128x256xf32>
    %3 = tpu.matmul %2, %1, %cst {dimension_numbers = #tpu.dot_dimension_numbers<[1], [0], [0], [1], [0, 0, 1, 1], [], []>} : vector<128x8xbf16>, vector<8x256xbf16>, vector<128x256xf32> -> vector<128x256xf32>
    %c0_3 = arith.constant 0 : index
    %c0_4 = arith.constant 0 : index
    %4 = vector.load %arg3[%c0_3, %c0_4] : memref<128x1xf32, #tpu.memory_space<vmem>>, vector<128x1xf32>
    %5 = vector.broadcast %4 : vector<128x1xf32> to vector<128x256xf32>
    %6 = arith.addf %3, %5 : vector<128x256xf32>
    %cst_5 = arith.constant 0.000000e+00 : f32
    %7 = vector.broadcast %cst_5 : f32 to vector<128x256xf32>
    %8 = arith.maximumf %6, %7 : vector<128x256xf32>
    %c0_6 = arith.constant 0 : index
    %c0_7 = arith.constant 0 : index
    %9 = vector.load %arg4[%c0_6, %c0_7] : memref<64x128xbf16, #tpu.memory_space<vmem>>, vector<64x128xbf16>
    %10 = arith.truncf %8 : vector<128x256xf32> to vector<128x256xbf16>
    %cst_8 = arith.constant dense<0.000000e+00> : vector<64x256xf32>
    %11 = tpu.matmul %9, %10, %cst_8 {dimension_numbers = #tpu.dot_dimension_numbers<[1], [0], [0], [1], [0, 0, 1, 1], [], []>} : vector<64x128xbf16>, vector<128x256xbf16>, vector<64x256xf32> -> vector<64x256xf32>
    %c0_9 = arith.constant 0 : index
    %c0_10 = arith.constant 0 : index
    %12 = vector.load %arg5[%c0_9, %c0_10] : memref<64x1xf32, #tpu.memory_space<vmem>>, vector<64x1xf32>
    %13 = vector.broadcast %12 : vector<64x1xf32> to vector<64x256xf32>
    %14 = arith.addf %11, %13 : vector<64x256xf32>
    %cst_11 = arith.constant 0.000000e+00 : f32
    %15 = vector.broadcast %cst_11 : f32 to vector<64x256xf32>
    %16 = arith.maximumf %14, %15 : vector<64x256xf32>
    %c0_12 = arith.constant 0 : index
    %c0_13 = arith.constant 0 : index
    %17 = vector.load %arg6[%c0_12, %c0_13] : memref<32x64xbf16, #tpu.memory_space<vmem>>, vector<32x64xbf16>
    %18 = arith.truncf %16 : vector<64x256xf32> to vector<64x256xbf16>
    %cst_14 = arith.constant dense<0.000000e+00> : vector<32x256xf32>
    %19 = tpu.matmul %17, %18, %cst_14 {dimension_numbers = #tpu.dot_dimension_numbers<[1], [0], [0], [1], [0, 0, 1, 1], [], []>} : vector<32x64xbf16>, vector<64x256xbf16>, vector<32x256xf32> -> vector<32x256xf32>
    %c0_15 = arith.constant 0 : index
    %c0_16 = arith.constant 0 : index
    %20 = vector.load %arg7[%c0_15, %c0_16] : memref<32x1xf32, #tpu.memory_space<vmem>>, vector<32x1xf32>
    %21 = vector.broadcast %20 : vector<32x1xf32> to vector<32x256xf32>
    %22 = arith.addf %19, %21 : vector<32x256xf32>
    %cst_17 = arith.constant 0.000000e+00 : f32
    %23 = vector.broadcast %cst_17 : f32 to vector<32x256xf32>
    %24 = arith.maximumf %22, %23 : vector<32x256xf32>
    %c0_18 = arith.constant 0 : index
    %c0_19 = arith.constant 0 : index
    %25 = vector.load %arg8[%c0_18, %c0_19] : memref<16x32xbf16, #tpu.memory_space<vmem>>, vector<16x32xbf16>
    %26 = arith.truncf %24 : vector<32x256xf32> to vector<32x256xbf16>
    %cst_20 = arith.constant dense<0.000000e+00> : vector<16x256xf32>
    %27 = tpu.matmul %25, %26, %cst_20 {dimension_numbers = #tpu.dot_dimension_numbers<[1], [0], [0], [1], [0, 0, 1, 1], [], []>} : vector<16x32xbf16>, vector<32x256xbf16>, vector<16x256xf32> -> vector<16x256xf32>
    %c0_21 = arith.constant 0 : index
    %c0_22 = arith.constant 0 : index
    %28 = vector.load %arg9[%c0_21, %c0_22] : memref<16x1xf32, #tpu.memory_space<vmem>>, vector<16x1xf32>
    %29 = vector.broadcast %28 : vector<16x1xf32> to vector<16x256xf32>
    %30 = arith.addf %27, %29 : vector<16x256xf32>
    %cst_23 = arith.constant 0.000000e+00 : f32
    %31 = vector.broadcast %cst_23 : f32 to vector<16x256xf32>
    %32 = arith.maximumf %30, %31 : vector<16x256xf32>
    %c0_24 = arith.constant 0 : index
    %c0_25 = arith.constant 0 : index
    %33 = vector.load %arg10[%c0_24, %c0_25] : memref<16x1xf32, #tpu.memory_space<vmem>>, vector<16x1xf32>
    %34 = vector.broadcast %33 : vector<16x1xf32> to vector<16x256xf32>
    %35 = arith.mulf %32, %34 : vector<16x256xf32>
    %cst_26 = arith.constant dense<0.000000e+00> : vector<256xf32>
    %36 = vector.multi_reduction <add>, %35, %cst_26 [0] : vector<16x256xf32> to vector<256xf32>
    %37 = vector.shape_cast %36 : vector<256xf32> to vector<1x256xf32>
    %c0_27 = arith.constant 0 : index
    %c0_28 = arith.constant 0 : index
    %38 = vector.load %arg11[%c0_27, %c0_28] : memref<1x1xf32, #tpu.memory_space<vmem>>, vector<1x1xf32>
    %39 = vector.broadcast %38 : vector<1x1xf32> to vector<1x256xf32>
    %40 = arith.addf %37, %39 : vector<1x256xf32>
    %c0_29 = arith.constant 0 : index
    %c0_30 = arith.constant 0 : index
    %41 = vector.load %arg12[%c0_29, %c0_30] : memref<1x256xf32, #tpu.memory_space<vmem>>, vector<1x256xf32>
    tpu.vector_store %arg12[%c0_29, %c0_30], %40 {strides = array<i32>} : memref<1x256xf32, #tpu.memory_space<vmem>>, vector<1x256xf32>,
    return
  }
  func.func @transform_0(%arg0: i32) -> (i32, i32) {
    %c0_i32 = arith.constant 0 : i32
    %c0_i32_0 = arith.constant 0 : i32
    return %c0_i32, %arg0 : i32, i32
  }
  func.func @transform_1(%arg0: i32) -> (i32, i32) {
    %c0_i32 = arith.constant 0 : i32
    %c0_i32_0 = arith.constant 0 : i32
    %c0_i32_1 = arith.constant 0 : i32
    return %c0_i32, %c0_i32_0 : i32, i32
  }
  func.func @transform_2(%arg0: i32) -> (i32, i32) {
    %c0_i32 = arith.constant 0 : i32
    %c0_i32_0 = arith.constant 0 : i32
    %c0_i32_1 = arith.constant 0 : i32
    return %c0_i32, %c0_i32_0 : i32, i32
  }
  func.func @transform_3(%arg0: i32) -> (i32, i32) {
    %c0_i32 = arith.constant 0 : i32
    %c0_i32_0 = arith.constant 0 : i32
    %c0_i32_1 = arith.constant 0 : i32
    return %c0_i32, %c0_i32_0 : i32, i32
  }
  func.func @transform_4(%arg0: i32) -> (i32, i32) {
    %c0_i32 = arith.constant 0 : i32
    %c0_i32_0 = arith.constant 0 : i32
    %c0_i32_1 = arith.constant 0 : i32
    return %c0_i32, %c0_i32_0 : i32, i32
  }
  func.func @transform_5(%arg0: i32) -> (i32, i32) {
    %c0_i32 = arith.constant 0 : i32
    %c0_i32_0 = arith.constant 0 : i32
    %c0_i32_1 = arith.constant 0 : i32
    return %c0_i32, %c0_i32_0 : i32, i32
  }
  func.func @transform_6(%arg0: i32) -> (i32, i32) {
    %c0_i32 = arith.constant 0 : i32
    %c0_i32_0 = arith.constant 0 : i32
    %c0_i32_1 = arith.constant 0 : i32
    return %c0_i32, %c0_i32_0 : i32, i32
  }
  func.func @transform_7(%arg0: i32) -> (i32, i32) {
    %c0_i32 = arith.constant 0 : i32
    %c0_i32_0 = arith.constant 0 : i32
    %c0_i32_1 = arith.constant 0 : i32
    return %c0_i32, %c0_i32_0 : i32, i32
  }
  func.func @transform_8(%arg0: i32) -> (i32, i32) {
    %c0_i32 = arith.constant 0 : i32
    %c0_i32_0 = arith.constant 0 : i32
    %c0_i32_1 = arith.constant 0 : i32
    return %c0_i32, %c0_i32_0 : i32, i32
  }
  func.func @transform_9(%arg0: i32) -> (i32, i32) {
    %c0_i32 = arith.constant 0 : i32
    %c0_i32_0 = arith.constant 0 : i32
    %c0_i32_1 = arith.constant 0 : i32
    return %c0_i32, %c0_i32_0 : i32, i32
  }
  func.func @transform_10(%arg0: i32) -> (i32, i32) {
    %c0_i32 = arith.constant 0 : i32
    %c0_i32_0 = arith.constant 0 : i32
    %c0_i32_1 = arith.constant 0 : i32
    return %c0_i32, %c0_i32_0 : i32, i32
  }
  func.func @transform_11(%arg0: i32) -> (i32, i32) {
    %c0_i32 = arith.constant 0 : i32
    %c0_i32_0 = arith.constant 0 : i32
    return %c0_i32, %arg0 : i32, i32
  }
}

</mosaic_0001>

<bundles_post_ra>
// kernel: tpu_custom_call.1
= control target key start
LH: loop header
LB: loop body
LE: loop exit
PB: predicated region body
PF: predicated region fallthrough
CT: control target
= control target key end

     0   :  { %s1738_s0 = inlined_call_operand.vmem [shape: f32[8,512], index: 0, kind: input, shape index: {}]   ;;  %s1739_s1 = inlined_call_operand.vmem [shape: bf16[128,8], index: 1, kind: input, shape index: {}]   ;;  %s1740_s2 = inlined_call_operand.vmem [shape: f32[128,1], index: 2, kind: input, shape index: {}]   ;;  %s1741_s3 = inlined_call_operand.vmem [shape: bf16[64,128], index: 3, kind: input, shape index: {}]   ;;  %s1742_s4 = inlined_call_operand.vmem [shape: f32[64,1], index: 4, kind: input, shape index: {}]   ;;  %s1743_s5 = inlined_call_operand.vmem [shape: bf16[32,64], index: 5, kind: input, shape index: {}]   ;;  %s1744_s6 = inlined_call_operand.vmem [shape: f32[32,1], index: 6, kind: input, shape index: {}]   ;;  %s1745_s7 = inlined_call_operand.vmem [shape: bf16[16,32], index: 7, kind: input, shape index: {}]   ;;  %s1746_s8 = inlined_call_operand.vmem [shape: f32[16,1], index: 8, kind: input, shape index: {}]   ;;  %s1747_s9 = inlined_call_operand.vmem [shape: f32[16,1], index: 9, kind: input, shape index: {}]   ;;  %s1748_s10 = inlined_call_operand.<no memory space> [shape: f32[1,1], index: 10, kind: input, shape index: {}]   ;;  %s1749_s11 = inlined_call_operand.hbm [shape: f32[1,512], index: 11, kind: output, shape index: {}]  }
   0x1   :  { %v16_v0 = vstv %s1748_s10 }
   0x2   :  { %17 = vst [vmem:[#allocation2] sm:$0x1] %v16_v0 }
   0x3   :  { %18 = vsyncpa [#allocation4], 0 }
   0x4   :  { %20 = vsyncpa [#allocation4 + $0x1], 0  ;;  %s1441_s19 = smov 0   ;;  %s1443_s20 = smov 0  }
   0x5   :  { %s1445_s21 = smov 0   ;;  %s1447_s22 = smov 0  }
   0x6 LB: > { %s1161_s10 = sadd.s32 4294967295, %s1375_s22   ;;  %s1162_s23 = sadd.s32 4294967294, %s1375_s22   ;;  %s1375_s22 = sphi %s1447_s22, %s1755_s22   ;;  %s1371_s21 = sphi %s1445_s21, %s1754_s21   ;;  %s1367_s20 = sphi %s1443_s20, %s1753_s20   ;;  %s1363_s19 = sphi %s1441_s19, %s1752_s19  }
   0x7   : > { %s1464_s24 = sadd.s32 1, %s1375_s22   ;;  %s269_s25 = sadd.s32 1, %s1371_s21 }
   0x8   : > { %s266_s26 = ssub.s32 %s1375_s22, %s1464_s24  ;;  %p279_p0 = scmp.ne.s32.totalorder %s1371_s21, %s1367_s20 }
   0x9   : > { %p267_p1 = scmp.eq.s32.totalorder %s266_s26, 0  ;;  %p280_p2 = scmp.eq.s32.totalorder %s1161_s10, 1 }
   0xa   : > { %p285_p3 = scmp.ne.s32.totalorder %s1367_s20, %s1363_s19  ;;  %p286_p4 = scmp.eq.s32.totalorder %s1162_s23, 1 }
   0xb   : > { %s1474_s27 = scalar_select %p267_p1, %s1371_s21, %s269_s25  }
   0xc   : > { %p1476_p5 = por %p280_p2, %p279_p0  ;;  %p1480_p6 = por %p286_p4, %p285_p3 }
   0xd   : > { %p1165_p7 = scmp.ge.s32.totalorder %s1375_s22, 1  ;;  %p343_p8 = scmp.lt.s32.totalorder %s1375_s22, 3 }
   0xf   : > { %p344_p9 = pnand %p1165_p7, %p343_p8 }
  0x10   : > { %s1489_s13 = sshll.u32 (!%p344_p9), %s1161_s10, 1  ;;  %s380_s30 = sand.u32 (!%p344_p9), 1, %s1367_s20  }
  0x11   : > { %347 = sbr.rel (%p344_p9) target bundleno = 863 (0x35f), region = 64  ;;  %p384_p10 = scmp.lt.s32.totalorder (!%p344_p9), %s1489_s13, 3 }
  0x12   : > { %s1166_s12 = sshll.u32 (!%p344_p9), %s380_s30, 1  ;;  %s1098_s16 = scalar_lea.hbm (!%p344_p9), %s1749_s11, %s1489_s13 }
  0x13   : > { %s382_s17 = scalar_lea.vmem (!%p344_p9), [#allocation3], %s1166_s12  ;;  %s1088_s23 = scalar_lea.sflag (!%p344_p9), [#allocation4], %s380_s30 }
  0x14   : > { %s1333_s14 = scalar_lea.hbm (!%p344_p9), %s1749_s11, 4 }
  0x16   : > { %v425_v1 = vld [vmem:[%s1740_s2 + $0x70] sm:$0xff]  ;;  %v1377_v2 = vmov 0   ;;  %v423_v3 = vld [vmem:[%s1740_s2 + $0x60] sm:$0xff]  ;;  %s385_s18 = scalar_select %p384_p10, %s1489_s13, 3  ;;  %v426_v5 = vld [vmem:[%s1740_s2 + $0x78] sm:$0xff]  ;;  %vm572_vm0 = vcmask 1043456  }
  0x17   : > { %1310 = vset.pattern.permute.xlu0 %v1377_v2  ;;  %1312 = vset.pattern.permute.xlu2 %v1377_v2  ;;  %v421_v4 = vld [vmem:[%s1740_s2 + $0x50] sm:$0xff]  ;;  %v424_v10 = vld [vmem:[%s1740_s2 + $0x68] sm:$0xff]  ;;  %v422_v11 = vld [vmem:[%s1740_s2 + $0x58] sm:$0xff]  ;;  %vm547_vm1 = vcmask 64512   ;;  %vm925_vm2 = vcmask 523264   ;;  %vm1001_vm3 = vcmask 261120  }
  0x18   : > { %499 = vperm.xlu0 %1310, %v425_v1   ;;  %1311 = vset.pattern.permute.xlu1 %v1377_v2  ;;  %s1168_s10 = sshll.u32 %s385_s18, 3  ;;  %v1255_v14 = vld [vmem:[%s1739_s1] sm:$0xff]  ;;  %v420_v16 = vld [vmem:[%s1740_s2 + $0x48] sm:$0xff]  ;;  %v417_v17 = vld [vmem:[%s1740_s2 + $0x30] sm:$0xff]  ;;  %s1100_s18 = sshll.u32 %s382_s17, 4  ;;  %vm1079_vm4 = vcmask 1040384   ;;  %s1101_s18 = int_to_ptr.vmem [resolvable:$true] %s1100_s18 }
  0x19   : > { %489 = vperm.xlu1 %1311, %v423_v3   ;;  %479 = vperm.xlu2 %1312, %v421_v4   ;;  %s387_s26 = scalar_lea.vmem %s1738_s0, %s1168_s10  ;;  %v419_v15 = vld [vmem:[%s1740_s2 + $0x40] sm:$0xff]  ;;  %v418_v18 = vld [vmem:[%s1740_s2 + $0x38] sm:$0xff]  ;;  %v416_v19 = vld [vmem:[%s1740_s2 + $0x28] sm:$0xff]  ;;  %s1102_s10 = sshll.u32 %s1098_s16, 4  ;;  %s1103_s10 = int_to_ptr.hbm [resolvable:$true] %s1102_s10 }
  0x1a   : > { %v391_v6 = vld [vmem:[%s387_s26] sm:$0xff]  ;;  %v392_v7 = vld [vmem:[%s387_s26 + $0x8] sm:$0xff]  ;;  %v413_v22 = vld [vmem:[%s1740_s2 + $0x10] sm:$0xff]  ;;  %s1327_s25 = sshra.s32 %s1103_s10, 4  ;;  %s1328_s25 = int_to_ptr.hbm [resolvable:$true] %s1327_s25 }
  0x1b   : > { %v393_v8 = vpack.c.bf16 %v391_v6, %v391_v6  ;;  %v394_v9 = vpack.c.bf16 %v392_v7, %v392_v7  ;;  %v415_v20 = vld [vmem:[%s1740_s2 + $0x20] sm:$0xff]  ;;  %v1256_v21 = vld [vmem:[%s1739_s1 + $0x8] sm:$0xff]  ;;  %v414_v23 = vld [vmem:[%s1740_s2 + $0x18] sm:$0xff]  ;;  %s1329_s13 = scalar_lea.hbm %s1328_s25, 2  ;;  %p1334_p0 = scmp.lt.s32.totalorder %s1328_s25, %s1749_s11 }
  0x1c   : > { %v411_v24 = vld [vmem:[%s1740_s2] sm:$0xff]  ;;  %v412_v25 = vld [vmem:[%s1740_s2 + $0x8] sm:$0xff]  ;;  %v1257_v26 = vld [vmem:[%s1739_s1 + $0x10] sm:$0xff]  ;;  %p1330_p11 = scmp.ne.s32.totalorder %s1328_s25, %s1329_s13  ;;  %p1335_p1 = scmp.lt.s32.totalorder %s1333_s14, %s1329_s13 }
  0x1d   : > { %v574_v12 = vsel %vm572_vm0, %v393_v8, 0  ;;  %v577_v13 = vsel %vm572_vm0, %v394_v9, 0  ;;  %v1258_v27 = vld [vmem:[%s1739_s1 + $0x18] sm:$0xff]  ;;  %v739_v28 = vld [vmem:[%s1742_s4 + $0x30] sm:$0xff]  ;;  %v737_v29 = vld [vmem:[%s1742_s4 + $0x20] sm:$0xff] }
  0x1e   : > { %586 = vmatpush.bf16.msra.mxu0 %v574_v12  ;;  %635 = vmatpush.bf16.msra.mxu1 %v577_v13  ;;  %v738_v30 = vld [vmem:[%s1742_s4 + $0x28] sm:$0xff]  ;;  %v736_v31 = vld [vmem:[%s1742_s4 + $0x18] sm:$0xff]  ;;  %v1259_v32 = vld [vmem:[%s1739_s1 + $0x20] sm:$0xff]  ;;  %p1331_p12 = pnand %p1330_p11, %p1476_p5  ;;  %p1336_p2 = por %p1335_p1, %p1334_p0 }
  0x1f   : > { %v733_v33 = vld [vmem:[%s1742_s4] sm:$0xff]  ;;  %v893_v34 = vld [vmem:[%s1744_s6 + $0x10] sm:$0xff]  ;;  %v894_v35 = vld [vmem:[%s1744_s6 + $0x18] sm:$0xff] }
  0x20   : > { %504 = vperm.xlu0 %1310, %v426_v5   ;;  %v1260_v36 = vld [vmem:[%s1739_s1 + $0x28] sm:$0xff]  ;;  %v740_v38 = vld [vmem:[%s1742_s4 + $0x38] sm:$0xff]  ;;  %v984_v39 = vld [vmem:[%s1746_s8] sm:$0xff]  ;;  %p1332_p13 = pneg %p1331_p12 }
  0x21   : > { %494 = vperm.xlu1 %1311, %v424_v10   ;;  %484 = vperm.xlu2 %1312, %v422_v11   ;;  %v892_v37 = vld [vmem:[%s1744_s6 + $0x8] sm:$0xff]  ;;  %v1037_v40 = vld [vmem:[%s1747_s9] sm:$0xff]  ;;  %v735_v41 = vld [vmem:[%s1742_s4 + $0x10] sm:$0xff] }
  0x22   : > { %1201 = vmatmul.msk.bf16.vlgmr.msra.gmra.mxu0 %vm547_vm1, %v1255_v14  ;;  %1209 = vmatmul.msk.bf16.vlgmr.msra.gmra.mxu1 %vm547_vm1, %v1255_v14  ;;  %v1038_v42 = vld [vmem:[%s1747_s9 + $0x8] sm:$0xff]  ;;  %v1261_v43 = vld [vmem:[%s1739_s1 + $0x30] sm:$0xff]  ;;  %v891_v47 = vld [vmem:[%s1744_s6] sm:$0xff]  ;;  %p1337_p3 = pnand %p1336_p2, %p1332_p13 }
  0x23   : > { %v734_v44 = vld [vmem:[%s1742_s4 + $0x8] sm:$0xff]  ;;  %v1262_v50 = vld [vmem:[%s1739_s1 + $0x38] sm:$0xff]  ;;  %v1067_v56 = vld [vmem:[#allocation2] sm:$0x1] }
  0x24   : > { %v985_v52 = vld [vmem:[%s1746_s8 + $0x8] sm:$0xff] }
  0x28   : > { %469 = vperm.xlu0 %1310, %v419_v15  }
  0x29   : > { %474 = vperm.xlu1 %1311, %v420_v16   ;;  %459 = vperm.xlu2 %1312, %v417_v17  }
  0x30   : > { %464 = vperm.xlu0 %1310, %v418_v18  }
  0x31   : > { %454 = vperm.xlu2 %1312, %v416_v19   ;;  %449 = vperm.xlu1 %1311, %v415_v20  }
  0x32   : > { %1202 = vmatmul.msk.bf16.gmra.mxu0 %vm547_vm1, %v1256_v21  ;;  %1210 = vmatmul.msk.bf16.gmra.mxu1 %vm547_vm1, %v1256_v21 }
  0x38   : > { %439 = vperm.xlu0 %1310, %v413_v22  }
  0x39   : > { %444 = vperm.xlu1 %1311, %v414_v23   ;;  %429 = vperm.xlu2 %1312, %v411_v24  }
  0x40   : > { %434 = vperm.xlu0 %1310, %v412_v25  }
  0x41   : > { %773 = vperm.xlu1 %1311, %v739_v28   ;;  %778 = vperm.xlu2 %1312, %v740_v38  }
  0x42   : > { %1203 = vmatmul.msk.bf16.gmra.mxu0 %vm547_vm1, %v1257_v26  ;;  %1211 = vmatmul.msk.bf16.gmra.mxu1 %vm547_vm1, %v1257_v26 }
  0x48   : > { %763 = vperm.xlu0 %1310, %v737_v29  }
  0x49   : > { %768 = vperm.xlu1 %1311, %v738_v30   ;;  %753 = vperm.xlu2 %1312, %v735_v41  }
  0x50   : > { %758 = vperm.xlu0 %1310, %v736_v31  }
  0x51   : > { %743 = vperm.xlu1 %1311, %v733_v33   ;;  %748 = vperm.xlu2 %1312, %v734_v44  }
  0x52   : > { %1204 = vmatmul.msk.bf16.gmra.mxu0 %vm547_vm1, %v1258_v27  ;;  %1212 = vmatmul.msk.bf16.gmra.mxu1 %vm547_vm1, %v1258_v27 }
  0x58   : > { %907 = vperm.xlu0 %1310, %v893_v34  }
  0x59   : > { %912 = vperm.xlu1 %1311, %v894_v35   ;;  %897 = vperm.xlu2 %1312, %v891_v47  }
  0x60   : > { %902 = vperm.xlu0 %1310, %v892_v37  }
  0x61   : > { %988 = vperm.xlu1 %1311, %v984_v39   ;;  %993 = vperm.xlu2 %1312, %v985_v52  }
  0x62   : > { %1205 = vmatmul.msk.bf16.gmra.mxu0 %vm547_vm1, %v1259_v32  ;;  %1213 = vmatmul.msk.bf16.gmra.mxu1 %vm547_vm1, %v1259_v32 }
  0x68   : > { %1041 = vperm.xlu0 %1310, %v1037_v40  }
  0x69   : > { %1046 = vperm.xlu1 %1311, %v1038_v42   ;;  %1070 = vperm.xlu2 %1312, %v1067_v56  }
  0x72   : > { %1206 = vmatmul.msk.bf16.gmra.mxu0 %vm547_vm1, %v1260_v36  ;;  %1214 = vmatmul.msk.bf16.gmra.mxu1 %vm547_vm1, %v1260_v36 }
  0x73   : > { %v1618_v45 = vpop.permute.xlu2 %479 }
  0x7b   : > { %v1627_v49 = vpop.permute.xlu2 %484 }
  0x82   : > { %1207 = vmatmul.msk.bf16.gmra.mxu0 %vm547_vm1, %v1261_v43  ;;  %1215 = vmatmul.msk.bf16.gmra.mxu1 %vm547_vm1, %v1261_v43 }
  0x83   : > { %v460_v54 = vpop.permute.xlu2 %459 }
  0x8a   : > { %v1620_v46 = vpop.permute.xlu0 %499 }
  0x8b   : > { %v1625_v48 = vpop.permute.xlu1 %489  ;;  %v455_v61 = vpop.permute.xlu2 %454 }
  0x92   : > { %v1632_v51 = vpop.permute.xlu0 %504  ;;  %1208 = vmatmul.msk.bf16.gmra.mxu0 %vm547_vm1, %v1262_v50  ;;  %1216 = vmatmul.msk.bf16.gmra.mxu1 %vm547_vm1, %v1262_v50 }
  0x93   : > { %v1639_v53 = vpop.permute.xlu1 %494  ;;  %v430_v2 = vpop.permute.xlu2 %429 }
  0x9a   : > { %v1641_v55 = vpop.permute.xlu0 %469 }
  0x9b   : > { %v1643_v60 = vpop.permute.xlu1 %474 }
  0x9f   : > { %v588_v57 = vpop.f32.mrf.mxu0  ;;  %v637_v58 = vpop.f32.mrf.mxu1 }
  0xa0   : > { %v589_v3 = vadd.f32 %v588_v57, %v430_v2  ;;  %v638_v4 = vadd.f32 %v637_v58, %v430_v2 }
  0xa2   : > { %v465_v59 = vpop.permute.xlu0 %464  ;;  %v677_v10 = vmax.f32 %v589_v3, 0.0  ;;  %v678_v11 = vmax.f32 %v638_v4, 0.0 }
  0xa3   : > { %v450_v1 = vpop.permute.xlu1 %449 }
  0xa7   : > { %v590_v62 = vpop.f32.mrf.mxu0  ;;  %v639_v63 = vpop.f32.mrf.mxu1 }
  0xaa   : > { %v440_v0 = vpop.permute.xlu0 %439 }
  0xab   : > { %v445_v14 = vpop.permute.xlu1 %444 }
  0xaf   : > { %v593_v5 = vpop.f32.mrf.mxu0  ;;  %v642_v6 = vpop.f32.mrf.mxu1 }
  0xb0   : > { %v594_v17 = vadd.f32 %v593_v5, %v440_v0  ;;  %v643_v18 = vadd.f32 %v642_v6, %v440_v0 }
  0xb2   : > { %v435_v7 = vpop.permute.xlu0 %434  ;;  %v681_v23 = vmax.f32 %v594_v17, 0.0  ;;  %v682_v24 = vmax.f32 %v643_v18, 0.0 }
  0xb3   : > { %v591_v8 = vadd.f32 %v590_v62, %v435_v7  ;;  %v640_v9 = vadd.f32 %v639_v63, %v435_v7 }
  0xb5   : > { %v679_v12 = vmax.f32 %v591_v8, 0.0  ;;  %v680_v13 = vmax.f32 %v640_v9, 0.0 }
  0xb7   : > { %v1645_v15 = vpack.c.bf16 %v679_v12, %v677_v10  ;;  %v1647_v16 = vpack.c.bf16 %v680_v13, %v678_v11  ;;  %v595_v19 = vpop.f32.mrf.mxu0  ;;  %v644_v20 = vpop.f32.mrf.mxu1 }
  0xb8   : > { %v596_v21 = vadd.f32 %v595_v19, %v445_v14  ;;  %v645_v22 = vadd.f32 %v644_v20, %v445_v14 }
  0xba   : > { %v683_v25 = vmax.f32 %v596_v21, 0.0  ;;  %v684_v26 = vmax.f32 %v645_v22, 0.0 }
  0xbc   : > { %v1649_v27 = vpack.c.bf16 %v683_v25, %v681_v23  ;;  %v1651_v28 = vpack.c.bf16 %v684_v26, %v682_v24 }
  0xbf   : > { %v598_v29 = vpop.f32.mrf.mxu0  ;;  %v647_v30 = vpop.f32.mrf.mxu1 }
  0xc0   : > { %v599_v31 = vadd.f32 %v598_v29, %v450_v1  ;;  %v648_v32 = vadd.f32 %v647_v30, %v450_v1 }
  0xc2   : > { %v685_v37 = vmax.f32 %v599_v31, 0.0  ;;  %v686_v38 = vmax.f32 %v648_v32, 0.0 }
  0xc7   : > { %v600_v33 = vpop.f32.mrf.mxu0  ;;  %v649_v34 = vpop.f32.mrf.mxu1 }
  0xc8   : > { %v601_v35 = vadd.f32 %v600_v33, %v455_v61  ;;  %v650_v36 = vadd.f32 %v649_v34, %v455_v61 }
  0xca   : > { %v687_v39 = vmax.f32 %v601_v35, 0.0  ;;  %v688_v40 = vmax.f32 %v650_v36, 0.0 }
  0xcc   : > { %v1653_v41 = vpack.c.bf16 %v687_v39, %v685_v37  ;;  %v1655_v42 = vpack.c.bf16 %v688_v40, %v686_v38 }
  0xcf   : > { %v603_v43 = vpop.f32.mrf.mxu0  ;;  %v652_v44 = vpop.f32.mrf.mxu1 }
  0xd0   : > { %v604_v47 = vadd.f32 %v603_v43, %v460_v54  ;;  %v653_v50 = vadd.f32 %v652_v44, %v460_v54 }
  0xd2   : > { %v689_v62 = vmax.f32 %v604_v47, 0.0  ;;  %v690_v63 = vmax.f32 %v653_v50, 0.0 }
  0xd7   : > { %v605_v52 = vpop.f32.mrf.mxu0  ;;  %v654_v56 = vpop.f32.mrf.mxu1 }
  0xd8   : > { %v606_v57 = vadd.f32 %v605_v52, %v465_v59  ;;  %v655_v58 = vadd.f32 %v654_v56, %v465_v59 }
  0xda   : > { %v691_v0 = vmax.f32 %v606_v57, 0.0  ;;  %v692_v61 = vmax.f32 %v655_v58, 0.0 }
  0xdc   : > { %v1657_v1 = vpack.c.bf16 %v691_v0, %v689_v62  ;;  %v1659_v2 = vpack.c.bf16 %v692_v61, %v690_v63 }
  0xdf   : > { %v608_v3 = vpop.f32.mrf.mxu0  ;;  %v657_v4 = vpop.f32.mrf.mxu1 }
  0xe0   : > { %v609_v50 = vadd.f32 %v608_v3, %v1641_v55  ;;  %v658_v52 = vadd.f32 %v657_v4, %v1641_v55  ;;  %v1263_v55 = vld [vmem:[%s1741_s3] sm:$0xff] }
  0xe2   : > { %v693_v0 = vmax.f32 %v609_v50, 0.0  ;;  %v694_v61 = vmax.f32 %v658_v52, 0.0 }
  0xe7   : > { %v610_v5 = vpop.f32.mrf.mxu0  ;;  %v659_v6 = vpop.f32.mrf.mxu1 }
  0xe8   : > { %v660_v40 = vadd.f32 %v659_v6, %v1643_v60 }
  0xea   : > { %v696_v58 = vmax.f32 %v660_v40, 0.0 }
  0xef   : > { %v613_v7 = vpop.f32.mrf.mxu0  ;;  %v662_v8 = vpop.f32.mrf.mxu1 }
  0xf0   : > { %v614_v37 = vadd.f32 %v613_v7, %v1618_v45 }
  0xf2   : > { %v697_v56 = vmax.f32 %v614_v37, 0.0 }
  0xf7   : > { %v615_v9 = vpop.f32.mrf.mxu0  ;;  %v664_v54 = vpop.f32.mrf.mxu1 }
  0xf8   : > { %v665_v33 = vadd.f32 %v664_v54, %v1627_v49 }
  0xfa   : > { %v700_v44 = vmax.f32 %v665_v33, 0.0 }
  0xff   : > { %v618_v10 = vpop.f32.mrf.mxu0  ;;  %v667_v11 = vpop.f32.mrf.mxu1 }
 0x100   : > { %v619_v25 = vadd.f32 %v618_v10, %v1625_v48  ;;  %v668_v26 = vadd.f32 %v667_v11, %v1625_v48  ;;  %v611_v48 = vadd.f32 %v610_v5, %v1643_v60  ;;  %v726_v5 = vpack.c.bf16 %v696_v58, %v694_v61  ;;  %v779_v10 = vpop.permute.xlu2 %778  ;;  %v774_v11 = vpop.permute.xlu1 %773 }
 0x102   : > { %v701_v38 = vmax.f32 %v619_v25, 0.0  ;;  %v702_v39 = vmax.f32 %v668_v26, 0.0 }
 0x107   : > { %v620_v12 = vpop.f32.mrf.mxu0  ;;  %v669_v59 = vpop.f32.mrf.mxu1 }
 0x108   : > { %v621_v21 = vadd.f32 %v620_v12, %v1639_v53  ;;  %v670_v22 = vadd.f32 %v669_v59, %v1639_v53 }
 0x10a   : > { %v703_v34 = vmax.f32 %v621_v21, 0.0  ;;  %v704_v35 = vmax.f32 %v670_v22, 0.0 }
 0x10c   : > { %v729_v47 = vpack.c.bf16 %v703_v34, %v701_v38 }
 0x10f   : > { %v623_v13 = vpop.f32.mrf.mxu0  ;;  %v672_v14 = vpop.f32.mrf.mxu1 }
 0x110   : > { %v624_v17 = vadd.f32 %v623_v13, %v1620_v46  ;;  %v673_v18 = vadd.f32 %v672_v14, %v1620_v46  ;;  %v616_v46 = vadd.f32 %v615_v9, %v1627_v49  ;;  %v730_v49 = vpack.c.bf16 %v704_v35, %v702_v39  ;;  %v764_v13 = vpop.permute.xlu0 %763  ;;  %v754_v14 = vpop.permute.xlu2 %753 }
 0x112   : > { %v705_v29 = vmax.f32 %v624_v17, 0.0  ;;  %v706_v30 = vmax.f32 %v673_v18, 0.0  ;;  %v699_v43 = vmax.f32 %v616_v46, 0.0  ;;  %v769_v17 = vpop.permute.xlu1 %768 }
 0x114   : > { %v727_v62 = vpack.c.bf16 %v699_v43, %v697_v56 }
 0x117   : > { %v625_v19 = vpop.f32.mrf.mxu0  ;;  %v674_v20 = vpop.f32.mrf.mxu1 }
 0x118   : > { %v626_v23 = vadd.f32 %v625_v19, %v1632_v51  ;;  %v675_v24 = vadd.f32 %v674_v20, %v1632_v51  ;;  %v663_v51 = vadd.f32 %v662_v8, %v1618_v45  ;;  %v695_v45 = vmax.f32 %v611_v48, 0.0  ;;  %v749_v38 = vpop.permute.xlu2 %748 }
 0x11a   : > { %v707_v31 = vmax.f32 %v626_v23, 0.0  ;;  %v708_v32 = vmax.f32 %v675_v24, 0.0  ;;  %v698_v57 = vmax.f32 %v663_v51, 0.0  ;;  %v725_v60 = vpack.c.bf16 %v695_v45, %v693_v0 }
 0x11c   : > { %v731_v36 = vpack.c.bf16 %v707_v31, %v705_v29  ;;  %v732_v53 = vpack.c.bf16 %v708_v32, %v706_v30  ;;  %v728_v63 = vpack.c.bf16 %v700_v44, %v698_v57  ;;  %v759_v30 = vpop.permute.xlu0 %758  ;;  %v744_v57 = vpop.permute.xlu1 %743 }
 0x11e   : > { %805 = vmatpush.bf16.msra.mxu2 %v731_v36  ;;  %834 = vmatpush.bf16.msra.mxu3 %v732_v53 }
 0x122   : > { %806 = vmatpush.bf16.msra.mxu2 %v729_v47  ;;  %835 = vmatpush.bf16.msra.mxu3 %v730_v49 }
 0x126   : > { %807 = vmatpush.bf16.msra.mxu2 %v727_v62  ;;  %836 = vmatpush.bf16.msra.mxu3 %v728_v63 }
 0x12a   : > { %808 = vmatpush.bf16.msra.mxu2 %v725_v60  ;;  %837 = vmatpush.bf16.msra.mxu3 %v726_v5 }
 0x12e   : > { %809 = vmatpush.bf16.msra.mxu2 %v1657_v1  ;;  %838 = vmatpush.bf16.msra.mxu3 %v1659_v2 }
 0x132   : > { %810 = vmatpush.bf16.msra.mxu2 %v1653_v41  ;;  %839 = vmatpush.bf16.msra.mxu3 %v1655_v42  ;;  %v1264_v41 = vld [vmem:[%s1741_s3 + $0x8] sm:$0xff] }
 0x136   : > { %811 = vmatpush.bf16.msra.mxu2 %v1649_v27  ;;  %840 = vmatpush.bf16.msra.mxu3 %v1651_v28  ;;  %v1265_v27 = vld [vmem:[%s1741_s3 + $0x10] sm:$0xff] }
 0x13a   : > { %812 = vmatpush.bf16.msra.mxu2 %v1645_v15  ;;  %841 = vmatpush.bf16.msra.mxu3 %v1647_v16  ;;  %v1266_v15 = vld [vmem:[%s1741_s3 + $0x18] sm:$0xff] }
 0x13d   : > { %813 = vmatmul.bf16.vlgmr.msra.gmra.mxu2 %v1263_v55  ;;  %842 = vmatmul.bf16.vlgmr.msra.gmra.mxu3 %v1263_v55 }
 0x14d   : > { %818 = vmatmul.bf16.gmra.mxu2 %v1264_v41  ;;  %847 = vmatmul.bf16.gmra.mxu3 %v1264_v41 }
 0x15d   : > { %823 = vmatmul.bf16.gmra.mxu2 %v1265_v27  ;;  %852 = vmatmul.bf16.gmra.mxu3 %v1265_v27 }
 0x16d   : > { %828 = vmatmul.bf16.gmra.mxu2 %v1266_v15  ;;  %857 = vmatmul.bf16.gmra.mxu3 %v1266_v15 }
 0x1c0   : > { %v814_v16 = vpop.f32.mrf.mxu2  ;;  %v843_v28 = vpop.f32.mrf.mxu3 }
 0x1c1   : > { %v815_v45 = vadd.f32 %v814_v16, %v744_v57  ;;  %v844_v58 = vadd.f32 %v843_v28, %v744_v57  ;;  %v1268_v16 = vld [vmem:[%s1743_s5 + $0x8] sm:$0xff] }
 0x1c3   : > { %v863_v55 = vmax.f32 %v815_v45, 0.0  ;;  %v864_v41 = vmax.f32 %v844_v58, 0.0 }
 0x1c8   : > { %v816_v42 = vpop.f32.mrf.mxu2  ;;  %v845_v1 = vpop.f32.mrf.mxu3 }
 0x1c9   : > { %v817_v44 = vadd.f32 %v816_v42, %v749_v38  ;;  %v846_v47 = vadd.f32 %v845_v1, %v749_v38  ;;  %v1267_v42 = vld [vmem:[%s1743_s5] sm:$0xff] }
 0x1cb   : > { %v865_v0 = vmax.f32 %v817_v44, 0.0  ;;  %v866_v61 = vmax.f32 %v846_v47, 0.0 }
 0x1cd   : > { %v883_v27 = vpack.c.bf16 %v865_v0, %v863_v55  ;;  %v884_v15 = vpack.c.bf16 %v866_v61, %v864_v41 }
 0x1d0   : > { %v819_v2 = vpop.f32.mrf.mxu2  ;;  %v848_v3 = vpop.f32.mrf.mxu3 }
 0x1d1   : > { %v820_v39 = vadd.f32 %v819_v2, %v754_v14  ;;  %v849_v48 = vadd.f32 %v848_v3, %v754_v14 }
 0x1d3   : > { %v867_v62 = vmax.f32 %v820_v39, 0.0  ;;  %v868_v63 = vmax.f32 %v849_v48, 0.0 }
 0x1d8   : > { %v821_v4 = vpop.f32.mrf.mxu2  ;;  %v850_v6 = vpop.f32.mrf.mxu3 }
 0x1d9   : > { %v822_v34 = vadd.f32 %v821_v4, %v759_v30  ;;  %v851_v35 = vadd.f32 %v850_v6, %v759_v30  ;;  %v908_v4 = vpop.permute.xlu0 %907 }
 0x1db   : > { %v869_v49 = vmax.f32 %v822_v34, 0.0  ;;  %v870_v50 = vmax.f32 %v851_v35, 0.0  ;;  %v1269_v34 = vld [vmem:[%s1745_s7] sm:$0xff] }
 0x1dd   : > { %v885_v60 = vpack.c.bf16 %v869_v49, %v867_v62  ;;  %v886_v5 = vpack.c.bf16 %v870_v50, %v868_v63 }
 0x1e0   : > { %v824_v7 = vpop.f32.mrf.mxu2  ;;  %v853_v8 = vpop.f32.mrf.mxu3 }
 0x1e1   : > { %v825_v26 = vadd.f32 %v824_v7, %v764_v13  ;;  %v854_v29 = vadd.f32 %v853_v8, %v764_v13  ;;  %v913_v8 = vpop.permute.xlu1 %912 }
 0x1e3   : > { %v871_v40 = vmax.f32 %v825_v26, 0.0  ;;  %v872_v43 = vmax.f32 %v854_v29, 0.0 }
 0x1e8   : > { %v826_v9 = vpop.f32.mrf.mxu2  ;;  %v855_v54 = vpop.f32.mrf.mxu3 }
 0x1e9   : > { %v827_v22 = vadd.f32 %v826_v9, %v769_v17  ;;  %v856_v23 = vadd.f32 %v855_v54, %v769_v17  ;;  %v903_v9 = vpop.permute.xlu0 %902 }
 0x1eb   : > { %v873_v36 = vmax.f32 %v827_v22, 0.0  ;;  %v874_v53 = vmax.f32 %v856_v23, 0.0 }
 0x1ed   : > { %v887_v52 = vpack.c.bf16 %v873_v36, %v871_v40  ;;  %v888_v56 = vpack.c.bf16 %v874_v53, %v872_v43  ;;  %v989_v53 = vpop.permute.xlu1 %988 }
 0x1f0   : > { %v829_v12 = vpop.f32.mrf.mxu2  ;;  %v858_v59 = vpop.f32.mrf.mxu3 }
 0x1f1   : > { %v830_v18 = vadd.f32 %v829_v12, %v774_v11  ;;  %v859_v19 = vadd.f32 %v858_v59, %v774_v11  ;;  %v898_v59 = vpop.permute.xlu2 %897 }
 0x1f3   : > { %v875_v31 = vmax.f32 %v830_v18, 0.0  ;;  %v876_v32 = vmax.f32 %v859_v19, 0.0 }
 0x1f8   : > { %v831_v20 = vpop.f32.mrf.mxu2  ;;  %v860_v21 = vpop.f32.mrf.mxu3 }
 0x1f9   : > { %v832_v24 = vadd.f32 %v831_v20, %v779_v10  ;;  %v861_v25 = vadd.f32 %v860_v21, %v779_v10  ;;  %v994_v38 = vpop.permute.xlu2 %993 }
 0x1fb   : > { %v877_v46 = vmax.f32 %v832_v24, 0.0  ;;  %v878_v33 = vmax.f32 %v861_v25, 0.0 }
 0x1fd   : > { %v889_v37 = vpack.c.bf16 %v877_v46, %v875_v31  ;;  %v890_v51 = vpack.c.bf16 %v878_v33, %v876_v32 }
 0x1ff   : > { %936 = vmatpush.bf16.msrb.mxu2 %v889_v37  ;;  %955 = vmatpush.bf16.msrb.mxu3 %v890_v51 }
 0x203   : > { %937 = vmatpush.bf16.msrb.mxu2 %v887_v52  ;;  %956 = vmatpush.bf16.msrb.mxu3 %v888_v56  ;;  %v1042_v52 = vpop.permute.xlu0 %1041  ;;  %v1047_v56 = vpop.permute.xlu1 %1046 }
 0x207   : > { %938 = vmatpush.bf16.msrb.mxu2 %v885_v60  ;;  %957 = vmatpush.bf16.msrb.mxu3 %v886_v5 }
 0x20b   : > { %939 = vmatpush.bf16.msrb.mxu2 %v883_v27  ;;  %958 = vmatpush.bf16.msrb.mxu3 %v884_v15 }
 0x20e   : > { %1241 = vmatmul.msk.bf16.vlgmr.msrb.gmra.mxu2 %vm925_vm2, %v1267_v42  ;;  %1243 = vmatmul.msk.bf16.vlgmr.msrb.gmra.mxu3 %vm925_vm2, %v1267_v42 }
 0x21e   : > { %1242 = vmatmul.msk.bf16.gmra.mxu2 %vm925_vm2, %v1268_v16  ;;  %1244 = vmatmul.msk.bf16.gmra.mxu3 %vm925_vm2, %v1268_v16  ;;  %v1071_v16 = vpop.permute.xlu2 %1070 }
 0x291   : > { %v941_v28 = vpop.f32.mrf.mxu2  ;;  %v960_v1 = vpop.f32.mrf.mxu3 }
 0x292   : > { %v942_v19 = vadd.f32 %v941_v28, %v898_v59  ;;  %v961_v20 = vadd.f32 %v960_v1, %v898_v59 }
 0x294   : > { %v970_v31 = vmax.f32 %v942_v19, 0.0  ;;  %v971_v32 = vmax.f32 %v961_v20, 0.0 }
 0x299   : > { %v943_v2 = vpop.f32.mrf.mxu2  ;;  %v962_v3 = vpop.f32.mrf.mxu3 }
 0x29a   : > { %v944_v13 = vadd.f32 %v943_v2, %v903_v9  ;;  %v963_v14 = vadd.f32 %v962_v3, %v903_v9  ;;  %v1073_v2 = vperm.slane %v1071_v16, 0 }
 0x29c   : > { %v972_v25 = vmax.f32 %v944_v13, 0.0  ;;  %v973_v26 = vmax.f32 %v963_v14, 0.0 }
 0x29e   : > { %v980_v46 = vpack.c.bf16 %v972_v25, %v970_v31  ;;  %v981_v33 = vpack.c.bf16 %v973_v26, %v971_v32 }
 0x2a1   : > { %v946_v6 = vpop.f32.mrf.mxu2  ;;  %v965_v7 = vpop.f32.mrf.mxu3 }
 0x2a2   : > { %v947_v54 = vadd.f32 %v946_v6, %v908_v4  ;;  %v966_v10 = vadd.f32 %v965_v7, %v908_v4  ;;  %v1082_v6 = vlaneseq }
 0x2a4   : > { %v974_v21 = vmax.f32 %v947_v54, 0.0  ;;  %v975_v22 = vmax.f32 %v966_v10, 0.0  ;;  %vm1084_vm5 = vcmp.lt.s32.totalorder %v1082_v6, 256 }
 0x2a9   : > { %v948_v11 = vpop.f32.mrf.mxu2  ;;  %v967_v12 = vpop.f32.mrf.mxu3 }
 0x2aa   : > { %v949_v17 = vadd.f32 %v948_v11, %v913_v8  ;;  %v968_v18 = vadd.f32 %v967_v12, %v913_v8 }
 0x2ac   : > { %v976_v23 = vmax.f32 %v949_v17, 0.0  ;;  %v977_v24 = vmax.f32 %v968_v18, 0.0 }
 0x2ae   : > { %v982_v29 = vpack.c.bf16 %v976_v23, %v974_v21  ;;  %v983_v30 = vpack.c.bf16 %v977_v24, %v975_v22 }
 0x2b0   : > { %1011 = vmatpush.bf16.msra.mxu2 %v982_v29  ;;  %1025 = vmatpush.bf16.msra.mxu3 %v983_v30 }
 0x2b4   : > { %1012 = vmatpush.bf16.msra.mxu2 %v980_v46  ;;  %1026 = vmatpush.bf16.msra.mxu3 %v981_v33 }
 0x2b7   : > { %1249 = vmatmul.msk.bf16.vlgmr.msra.gmra.mxu2 %vm1001_vm3, %v1269_v34  ;;  %1250 = vmatmul.msk.bf16.vlgmr.msra.gmra.mxu3 %vm1001_vm3, %v1269_v34 }
 0x33a   : > { %v1014_v35 = vpop.f32.mrf.mxu2  ;;  %v1028_v36 = vpop.f32.mrf.mxu3 }
 0x33b   : > { %v1015_v37 = vadd.f32 %v1014_v35, %v989_v53  ;;  %v1029_v51 = vadd.f32 %v1028_v36, %v989_v53 }
 0x33d   : > { %v1033_v40 = vmax.f32 %v1015_v37, 0.0  ;;  %v1034_v43 = vmax.f32 %v1029_v51, 0.0 }
 0x33f   : > { %v1049_v57 = vmul.f32 %v1042_v52, %v1033_v40  ;;  %v1050_v45 = vmul.f32 %v1042_v52, %v1034_v43 }
 0x342   : > { %v1016_v39 = vpop.f32.mrf.mxu2  ;;  %v1030_v48 = vpop.f32.mrf.mxu3 }
 0x343   : > { %v1017_v44 = vadd.f32 %v1016_v39, %v994_v38  ;;  %v1031_v47 = vadd.f32 %v1030_v48, %v994_v38 }
 0x345   : > { %v1035_v49 = vmax.f32 %v1017_v44, 0.0  ;;  %v1036_v50 = vmax.f32 %v1031_v47, 0.0 }
 0x347   : > { %v1051_v58 = vmul.f32 %v1047_v56, %v1035_v49  ;;  %v1052_v62 = vmul.f32 %v1047_v56, %v1036_v50 }
 0x349   : > { %v1053_v63 = vadd.f32 %v1051_v58, %v1049_v57  ;;  %v1060_v0 = vadd.f32 %v1052_v62, %v1050_v45 }
 0x34b   : > { %v1054_v61 = vrot.slane %v1053_v63, 4  ;;  %v1061_v60 = vrot.slane %v1060_v0, 4 }
 0x34d   : > { %v1055_v5 = vadd.f32 %v1054_v61, %v1053_v63  ;;  %v1062_v55 = vadd.f32 %v1061_v60, %v1060_v0 }
 0x34f   : > { %v1056_v41 = vrot.slane %v1055_v5, 2  ;;  %v1063_v27 = vrot.slane %v1062_v55, 2 }
 0x351   : > { %v1057_v15 = vadd.f32 %v1056_v41, %v1055_v5  ;;  %v1064_v42 = vadd.f32 %v1063_v27, %v1062_v55 }
 0x353   : > { %v1058_v28 = vrot.slane %v1057_v15, 1  ;;  %v1065_v1 = vrot.slane %v1064_v42, 1 }
 0x355   : > { %v1059_v3 = vadd.f32 %v1058_v28, %v1057_v15  ;;  %v1066_v4 = vadd.f32 %v1065_v1, %v1064_v42 }
 0x357   : > { %v1075_v7 = vadd.f32 %v1073_v2, %v1066_v4  ;;  %v1074_v8 = vadd.f32 %v1073_v2, %v1059_v3 }
 0x359   : > { %v1078_v9 = vrot.slane %v1075_v7, 7 }
 0x35b   : > { %v1080_v54 = vsel %vm1079_vm4, %v1074_v8, %v1078_v9 }
 0x35c   : > { %1086 = vst.msk [vmem:[%s382_s17] sm:$0x3] %vm1084_vm5, %v1080_v54 }
 0x35d   : > { %1340 = shalt.err (!%p1337_p3)
}
 0x35e   : > { %1270 = dma.vmem_to_hbm [thread:$0]  (%p1476_p5), %s1101_s18, 32, %s1103_s10, %s1088_s23  }
 0x35f PF: > { %p1276_p4 = scmp.ge.s32.totalorder %s1375_s22, 2  ;;  %s1114_s30 = sand.u32 1, %s1363_s19  }
 0x360   : > { %s1115_s17 = scalar_lea.sflag [#allocation4], %s1114_s30 }
 0x361   : > { %p1273_p7 = pnand %p1276_p4, %p1480_p6 }
 0x363   : > { %p1274_p8 = pneg %p1273_p7 }
 0x365   : > { %1358 = dma.done.wait (%p1274_p8), %s1115_s17, 32  }
 0x366   : > { %1360 = vsyncadd (%p1274_p8), %s1115_s17, 4294967264  ;;  %p23_p9 = scmp.ge.s32.totalorder %s1464_s24, 4   ;;  %s1752_s19 = smov %s1367_s20 }
 0x367   : > { %s1753_s20 = smov %s1371_s21  ;;  %s1754_s21 = smov %s1474_s27 }
 0x368   : > { %s1755_s22 = smov %s1464_s24  ;;  %25 = sbr.rel (!%p23_p9) target bundleno = 6 (0x6), region = 99 }
 0x36d   :  { %1121 = vsyncpa [#allocation4], 1 }
 0x36e   :  { %1123 = vsyncpa [#allocation4 + $0x1], 1 }

</bundles_post_ra>
